<compile_context>
chip_gen: v7x
topology: tpu7x:2x2x1
jax: 0.10.0
libtpu: 0.0.40
codegen_flags: <defaults>
</compile_context>

<pallas_src>
import jax
import jax.numpy as jnp
from jax.experimental import pallas as pl
from jax.experimental.pallas import tpu as pltpu


def make_kernel(offs, set_size, dim_hidden, emb_size):
    S, H, E = set_size, dim_hidden, emb_size

    def kernel(x_ref, w128_ref, wdec3_ref, b_ref, emb_ref, proj_ref):
        f32, bf16 = jnp.float32, jnp.bfloat16
        bias = b_ref[...]                                        # (9, E) f32

        def lin(h_f32, layer_idx, bias_idx, relu):
            """y = h @ W + b: bf16 MXU matmul, f32 accumulate + elementwise."""
            r0, r1 = offs[layer_idx], offs[layer_idx + 1]
            w = w128_ref[r0:r1, :]                               # (din, H) bf16
            acc = jnp.dot(h_f32.astype(bf16), w, preferred_element_type=f32)
            acc = acc + bias[bias_idx:bias_idx + 1, :H]
            return jnp.maximum(acc, 0.0) if relu else acc

        # ---- DeepSet encoder -------------------------------------------------
        h = x_ref[...]                                           # (tb*S, D) f32
        h = lin(h, 0, 0, True)
        h = lin(h, 1, 1, True)
        h = lin(h, 2, 2, True)
        h = lin(h, 3, 3, False)                                  # (tb*S, H)

        # ---- mean over the set axis (no pool matmul) ---------------------------
        tb = h.shape[0] // S
        h = jnp.sum(h.reshape(tb, S, H), axis=1) * (1.0 / S)     # (tb, H)

        # ---- DeepSet decoder ---------------------------------------------------
        h = lin(h, 4, 4, True)
        h = lin(h, 5, 5, True)
        h = lin(h, 6, 6, True)
        emb = jnp.dot(h.astype(bf16), wdec3_ref[...],
                      preferred_element_type=f32) + bias[7:8, :E]   # (tb, E)
        # num_outputs == 1, so reshape(-1, 1, E) + Rearrange 'a b c -> a (b c)'
        # is the identity on (tb, E).
        emb_ref[...] = emb

        # ---- projection head ---------------------------------------------------
        proj_ref[...] = lin(jnp.maximum(emb, 0.0), 7, 8, False)     # (tb, P)

    return kernel


def init_params(key, dim_input, dim_hidden, emb_size, proj_out):
    """Deterministic synthetic parameters. Weights (in, out); biases (1, out)."""
    dims = ([(dim_input, dim_hidden)] + [(dim_hidden, dim_hidden)] * 3 +   # enc
            [(dim_hidden, dim_hidden)] * 3 + [(dim_hidden, emb_size)] +    # dec
            [(emb_size, proj_out)])                                        # proj
    params = []
    for (din, dout) in dims:
        key, kw, kb = jax.random.split(key, 3)
        w = jax.random.normal(kw, (din, dout), jnp.float32) * 0.05
        b = jax.random.normal(kb, (1, dout), jnp.float32) * 0.05
        params.append((w, b))
    return params  # 4 enc, 4 dec, 1 proj


def pack_params(params, emb_size):
    """Pack parameters into: w128 (rows, H) bf16 (all out-width-H layers, in
    usage order enc0..enc3, dec0..dec2, proj), wdec3 (H, E) bf16, and a single
    (9, E) f32 bias buffer.  Returns static row offsets into w128."""
    w_order = (0, 1, 2, 3, 4, 5, 6, 8)
    offs = [0]
    for i in w_order:
        offs.append(offs[-1] + int(params[i][0].shape[0]))
    assert all(o % 8 == 0 for o in offs), "packed weight slices must be sublane-aligned"
    w128 = jnp.concatenate([params[i][0] for i in w_order],
                           axis=0).astype(jnp.bfloat16)          # (sum_rows, H)
    wdec3 = params[7][0].astype(jnp.bfloat16)                    # (H, E)
    brows = [jnp.pad(params[i][1][0], (0, emb_size - params[i][1].shape[1]))
             for i in range(9)]
    biases = jnp.stack(brows).astype(jnp.float32)                # (9, E)
    return w128, wdec3, biases, tuple(offs)


def contrastive_forward(x, params, *, tb=8):
    """x: (B, S, D) f32 -> (emb (B, emb_size) f32, proj (B, proj_out) f32)."""
    B, S, D = x.shape
    H = params[1][0].shape[0]          # dim_hidden
    E = params[7][0].shape[1]          # emb_size
    P = params[8][0].shape[1]          # projection_head_out_size
    assert B % tb == 0 and (tb * S) % 8 == 0
    assert P == H, "packed-weight layout assumes proj_out == dim_hidden"

    w128, wdec3, biases, offs = pack_params(params, E)
    x2 = x.reshape(B * S, D)           # batch-major flatten: row = b*S + s

    kernel = make_kernel(offs, S, H, E)
    emb, proj = pl.pallas_call(
        kernel,
        out_shape=(jax.ShapeDtypeStruct((B, E), jnp.float32),
                   jax.ShapeDtypeStruct((B, P), jnp.float32)),
        grid=(B // tb,),
        in_specs=[
            pl.BlockSpec((tb * S, D), lambda i: (i, 0)),   # tb whole sets per step
            pl.BlockSpec(w128.shape, lambda i: (0, 0)),    # packed weights, resident
            pl.BlockSpec(wdec3.shape, lambda i: (0, 0)),
            pl.BlockSpec(biases.shape, lambda i: (0, 0)),
        ],
        out_specs=(pl.BlockSpec((tb, E), lambda i: (i, 0)),
                   pl.BlockSpec((tb, P), lambda i: (i, 0))),
        compiler_params=pltpu.CompilerParams(
            dimension_semantics=("parallel",)),
    )(x2, w128, wdec3, biases)
    return emb, proj


def reference_forward(x, params):
    """Plain-JAX (f32) reference of the PyTorch forward."""
    enc, dec, proj = params[:4], params[4:8], params[8]
    h = x
    for i, (w, b) in enumerate(enc):
        h = h @ w + b
        if i < 3:
            h = jnp.maximum(h, 0.0)
    h = h.mean(axis=-2)
    for i, (w, b) in enumerate(dec):
        h = h @ w + b
        if i < 3:
            h = jnp.maximum(h, 0.0)
    emb = h.reshape(h.shape[0], -1)    # num_outputs = 1 -> identity
    p = jnp.maximum(emb, 0.0) @ proj[0] + proj[1]
    return emb, p


if __name__ == "__main__":
    # small shapes, module-default (lane-dense) widths:
    # batch=16, set=16, input_size=16, dim_hidden=128, emb=256, proj=128
    B, S, D = 16, 16, 16
    dim_hidden, emb_size, proj_out = 128, 256, 128

    key = jax.random.PRNGKey(0)
    kx, kp = jax.random.split(key)
    x = jax.random.normal(kx, (B, S, D), jnp.float32)
    params = init_params(kp, D, dim_hidden, emb_size, proj_out)

    emb, proj = contrastive_forward(x, params, tb=8)
    jax.block_until_ready((emb, proj))

    emb_ref, proj_ref = reference_forward(x, params)
    assert emb.shape == (B, emb_size) and proj.shape == (B, proj_out)
    # bf16 matmul inputs with f32 accumulation -> loosened tolerance vs f32 ref
    assert jnp.allclose(emb, emb_ref, atol=5e-3, rtol=5e-2), \
        float(jnp.max(jnp.abs(emb - emb_ref)))
    assert jnp.allclose(proj, proj_ref, atol=5e-3, rtol=5e-2), \
        float(jnp.max(jnp.abs(proj - proj_ref)))

    print("KERNEL_OK")
</pallas_src>

<mosaic_0001>
module attributes {stable_mosaic.version = 11 : i64} {
  func.func @kernel(%arg0: i32, %arg1: memref<128x16xf32, #tpu.memory_space<vmem>>, %arg2: memref<1040x128xbf16, #tpu.memory_space<vmem>>, %arg3: memref<128x256xbf16, #tpu.memory_space<vmem>>, %arg4: memref<9x256xf32, #tpu.memory_space<vmem>>, %arg5: memref<8x256xf32, #tpu.memory_space<vmem>>, %arg6: memref<8x128xf32, #tpu.memory_space<vmem>>) attributes {dimension_semantics = [#tpu.dimension_semantics<parallel>], iteration_bounds = array<i64: 2>, scalar_prefetch = 0 : i64, scratch_operands = 0 : i64, tpu.core_type = #tpu.core_type<tc>, window_params = [{transform_indices = @transform_0, window_bounds = array<i64: 128, 16>}, {pipeline_mode = #tpu.pipeline_mode<synchronous>, transform_indices = @transform_1, window_bounds = array<i64: 1040, 128>}, {pipeline_mode = #tpu.pipeline_mode<synchronous>, transform_indices = @transform_2, window_bounds = array<i64: 128, 256>}, {pipeline_mode = #tpu.pipeline_mode<synchronous>, transform_indices = @transform_3, window_bounds = array<i64: 9, 256>}, {transform_indices = @transform_4, window_bounds = array<i64: 8, 256>}, {transform_indices = @transform_5, window_bounds = array<i64: 8, 128>}]} {
    %c0 = arith.constant 0 : index
    %c0_0 = arith.constant 0 : index
    %0 = vector.load %arg4[%c0, %c0_0] : memref<9x256xf32, #tpu.memory_space<vmem>>, vector<9x256xf32>
    %c0_1 = arith.constant 0 : index
    %c0_2 = arith.constant 0 : index
    %1 = vector.load %arg1[%c0_1, %c0_2] : memref<128x16xf32, #tpu.memory_space<vmem>>, vector<128x16xf32>
    %c0_3 = arith.constant 0 : index
    %c0_4 = arith.constant 0 : index
    %2 = vector.load %arg2[%c0_3, %c0_4] : memref<1040x128xbf16, #tpu.memory_space<vmem>>, vector<16x128xbf16>
    %3 = arith.truncf %1 : vector<128x16xf32> to vector<128x16xbf16>
    %cst = arith.constant dense<0.000000e+00> : vector<128x128xf32>
    %4 = tpu.matmul %3, %2, %cst {dimension_numbers = #tpu.dot_dimension_numbers<[1], [0], [0], [1], [0, 0, 1, 1], [], []>} : vector<128x16xbf16>, vector<16x128xbf16>, vector<128x128xf32> -> vector<128x128xf32>
    %5 = vector.extract_strided_slice %0 {offsets = [0, 0], sizes = [1, 128], strides = [1, 1]} : vector<9x256xf32> to vector<1x128xf32>
    %6 = vector.broadcast %5 : vector<1x128xf32> to vector<128x128xf32>
    %7 = arith.addf %4, %6 : vector<128x128xf32>
    %cst_5 = arith.constant 0.000000e+00 : f32
    %8 = vector.broadcast %cst_5 : f32 to vector<128x128xf32>
    %9 = arith.maximumf %7, %8 : vector<128x128xf32>
    %c16 = arith.constant 16 : index
    %c0_6 = arith.constant 0 : index
    %10 = vector.load %arg2[%c16, %c0_6] : memref<1040x128xbf16, #tpu.memory_space<vmem>>, vector<128x128xbf16>
    %11 = arith.truncf %9 : vector<128x128xf32> to vector<128x128xbf16>
    %cst_7 = arith.constant dense<0.000000e+00> : vector<128x128xf32>
    %12 = tpu.matmul %11, %10, %cst_7 {dimension_numbers = #tpu.dot_dimension_numbers<[1], [0], [0], [1], [0, 0, 1, 1], [], []>} : vector<128x128xbf16>, vector<128x128xbf16>, vector<128x128xf32> -> vector<128x128xf32>
    %13 = vector.extract_strided_slice %0 {offsets = [1, 0], sizes = [1, 128], strides = [1, 1]} : vector<9x256xf32> to vector<1x128xf32>
    %14 = vector.broadcast %13 : vector<1x128xf32> to vector<128x128xf32>
    %15 = arith.addf %12, %14 : vector<128x128xf32>
    %cst_8 = arith.constant 0.000000e+00 : f32
    %16 = vector.broadcast %cst_8 : f32 to vector<128x128xf32>
    %17 = arith.maximumf %15, %16 : vector<128x128xf32>
    %c144 = arith.constant 144 : index
    %c0_9 = arith.constant 0 : index
    %18 = vector.load %arg2[%c144, %c0_9] : memref<1040x128xbf16, #tpu.memory_space<vmem>>, vector<128x128xbf16>
    %19 = arith.truncf %17 : vector<128x128xf32> to vector<128x128xbf16>
    %cst_10 = arith.constant dense<0.000000e+00> : vector<128x128xf32>
    %20 = tpu.matmul %19, %18, %cst_10 {dimension_numbers = #tpu.dot_dimension_numbers<[1], [0], [0], [1], [0, 0, 1, 1], [], []>} : vector<128x128xbf16>, vector<128x128xbf16>, vector<128x128xf32> -> vector<128x128xf32>
    %21 = vector.extract_strided_slice %0 {offsets = [2, 0], sizes = [1, 128], strides = [1, 1]} : vector<9x256xf32> to vector<1x128xf32>
    %22 = vector.broadcast %21 : vector<1x128xf32> to vector<128x128xf32>
    %23 = arith.addf %20, %22 : vector<128x128xf32>
    %cst_11 = arith.constant 0.000000e+00 : f32
    %24 = vector.broadcast %cst_11 : f32 to vector<128x128xf32>
    %25 = arith.maximumf %23, %24 : vector<128x128xf32>
    %c272 = arith.constant 272 : index
    %c0_12 = arith.constant 0 : index
    %26 = vector.load %arg2[%c272, %c0_12] : memref<1040x128xbf16, #tpu.memory_space<vmem>>, vector<128x128xbf16>
    %27 = arith.truncf %25 : vector<128x128xf32> to vector<128x128xbf16>
    %cst_13 = arith.constant dense<0.000000e+00> : vector<128x128xf32>
    %28 = tpu.matmul %27, %26, %cst_13 {dimension_numbers = #tpu.dot_dimension_numbers<[1], [0], [0], [1], [0, 0, 1, 1], [], []>} : vector<128x128xbf16>, vector<128x128xbf16>, vector<128x128xf32> -> vector<128x128xf32>
    %29 = vector.extract_strided_slice %0 {offsets = [3, 0], sizes = [1, 128], strides = [1, 1]} : vector<9x256xf32> to vector<1x128xf32>
    %30 = vector.broadcast %29 : vector<1x128xf32> to vector<128x128xf32>
    %31 = arith.addf %28, %30 : vector<128x128xf32>
    %32 = vector.shape_cast %31 : vector<128x128xf32> to vector<8x16x128xf32>
    %cst_14 = arith.constant dense<0.000000e+00> : vector<8x128xf32>
    %33 = vector.multi_reduction <add>, %32, %cst_14 [1] : vector<8x16x128xf32> to vector<8x128xf32>
    %cst_15 = arith.constant 6.250000e-02 : f32
    %34 = vector.broadcast %cst_15 : f32 to vector<8x128xf32>
    %35 = arith.mulf %33, %34 : vector<8x128xf32>
    %c400 = arith.constant 400 : index
    %c0_16 = arith.constant 0 : index
    %36 = vector.load %arg2[%c400, %c0_16] : memref<1040x128xbf16, #tpu.memory_space<vmem>>, vector<128x128xbf16>
    %37 = arith.truncf %35 : vector<8x128xf32> to vector<8x128xbf16>
    %cst_17 = arith.constant dense<0.000000e+00> : vector<8x128xf32>
    %38 = tpu.matmul %37, %36, %cst_17 {dimension_numbers = #tpu.dot_dimension_numbers<[1], [0], [0], [1], [0, 0, 1, 1], [], []>} : vector<8x128xbf16>, vector<128x128xbf16>, vector<8x128xf32> -> vector<8x128xf32>
    %39 = vector.extract_strided_slice %0 {offsets = [4, 0], sizes = [1, 128], strides = [1, 1]} : vector<9x256xf32> to vector<1x128xf32>
    %40 = vector.broadcast %39 : vector<1x128xf32> to vector<8x128xf32>
    %41 = arith.addf %38, %40 : vector<8x128xf32>
    %cst_18 = arith.constant 0.000000e+00 : f32
    %42 = vector.broadcast %cst_18 : f32 to vector<8x128xf32>
    %43 = arith.maximumf %41, %42 : vector<8x128xf32>
    %c528 = arith.constant 528 : index
    %c0_19 = arith.constant 0 : index
    %44 = vector.load %arg2[%c528, %c0_19] : memref<1040x128xbf16, #tpu.memory_space<vmem>>, vector<128x128xbf16>
    %45 = arith.truncf %43 : vector<8x128xf32> to vector<8x128xbf16>
    %cst_20 = arith.constant dense<0.000000e+00> : vector<8x128xf32>
    %46 = tpu.matmul %45, %44, %cst_20 {dimension_numbers = #tpu.dot_dimension_numbers<[1], [0], [0], [1], [0, 0, 1, 1], [], []>} : vector<8x128xbf16>, vector<128x128xbf16>, vector<8x128xf32> -> vector<8x128xf32>
    %47 = vector.extract_strided_slice %0 {offsets = [5, 0], sizes = [1, 128], strides = [1, 1]} : vector<9x256xf32> to vector<1x128xf32>
    %48 = vector.broadcast %47 : vector<1x128xf32> to vector<8x128xf32>
    %49 = arith.addf %46, %48 : vector<8x128xf32>
    %cst_21 = arith.constant 0.000000e+00 : f32
    %50 = vector.broadcast %cst_21 : f32 to vector<8x128xf32>
    %51 = arith.maximumf %49, %50 : vector<8x128xf32>
    %c656 = arith.constant 656 : index
    %c0_22 = arith.constant 0 : index
    %52 = vector.load %arg2[%c656, %c0_22] : memref<1040x128xbf16, #tpu.memory_space<vmem>>, vector<128x128xbf16>
    %53 = arith.truncf %51 : vector<8x128xf32> to vector<8x128xbf16>
    %cst_23 = arith.constant dense<0.000000e+00> : vector<8x128xf32>
    %54 = tpu.matmul %53, %52, %cst_23 {dimension_numbers = #tpu.dot_dimension_numbers<[1], [0], [0], [1], [0, 0, 1, 1], [], []>} : vector<8x128xbf16>, vector<128x128xbf16>, vector<8x128xf32> -> vector<8x128xf32>
    %55 = vector.extract_strided_slice %0 {offsets = [6, 0], sizes = [1, 128], strides = [1, 1]} : vector<9x256xf32> to vector<1x128xf32>
    %56 = vector.broadcast %55 : vector<1x128xf32> to vector<8x128xf32>
    %57 = arith.addf %54, %56 : vector<8x128xf32>
    %cst_24 = arith.constant 0.000000e+00 : f32
    %58 = vector.broadcast %cst_24 : f32 to vector<8x128xf32>
    %59 = arith.maximumf %57, %58 : vector<8x128xf32>
    %60 = arith.truncf %59 : vector<8x128xf32> to vector<8x128xbf16>
    %c0_25 = arith.constant 0 : index
    %c0_26 = arith.constant 0 : index
    %61 = vector.load %arg3[%c0_25, %c0_26] : memref<128x256xbf16, #tpu.memory_space<vmem>>, vector<128x256xbf16>
    %cst_27 = arith.constant dense<0.000000e+00> : vector<8x256xf32>
    %62 = tpu.matmul %60, %61, %cst_27 {dimension_numbers = #tpu.dot_dimension_numbers<[1], [0], [0], [1], [0, 0, 1, 1], [], []>} : vector<8x128xbf16>, vector<128x256xbf16>, vector<8x256xf32> -> vector<8x256xf32>
    %63 = vector.extract_strided_slice %0 {offsets = [7, 0], sizes = [1, 256], strides = [1, 1]} : vector<9x256xf32> to vector<1x256xf32>
    %64 = vector.broadcast %63 : vector<1x256xf32> to vector<8x256xf32>
    %65 = arith.addf %62, %64 : vector<8x256xf32>
    %c0_28 = arith.constant 0 : index
    %c0_29 = arith.constant 0 : index
    %66 = vector.load %arg5[%c0_28, %c0_29] : memref<8x256xf32, #tpu.memory_space<vmem>>, vector<8x256xf32>
    tpu.vector_store %arg5[%c0_28, %c0_29], %65 {strides = array<i32>} : memref<8x256xf32, #tpu.memory_space<vmem>>, vector<8x256xf32>,
    %cst_30 = arith.constant 0.000000e+00 : f32
    %67 = vector.broadcast %cst_30 : f32 to vector<8x256xf32>
    %68 = arith.maximumf %65, %67 : vector<8x256xf32>
    %c784 = arith.constant 784 : index
    %c0_31 = arith.constant 0 : index
    %69 = vector.load %arg2[%c784, %c0_31] : memref<1040x128xbf16, #tpu.memory_space<vmem>>, vector<256x128xbf16>
    %70 = arith.truncf %68 : vector<8x256xf32> to vector<8x256xbf16>
    %cst_32 = arith.constant dense<0.000000e+00> : vector<8x128xf32>
    %71 = tpu.matmul %70, %69, %cst_32 {dimension_numbers = #tpu.dot_dimension_numbers<[1], [0], [0], [1], [0, 0, 1, 1], [], []>} : vector<8x256xbf16>, vector<256x128xbf16>, vector<8x128xf32> -> vector<8x128xf32>
    %72 = vector.extract_strided_slice %0 {offsets = [8, 0], sizes = [1, 128], strides = [1, 1]} : vector<9x256xf32> to vector<1x128xf32>
    %73 = vector.broadcast %72 : vector<1x128xf32> to vector<8x128xf32>
    %74 = arith.addf %71, %73 : vector<8x128xf32>
    %c0_33 = arith.constant 0 : index
    %c0_34 = arith.constant 0 : index
    %75 = vector.load %arg6[%c0_33, %c0_34] : memref<8x128xf32, #tpu.memory_space<vmem>>, vector<8x128xf32>
    tpu.vector_store %arg6[%c0_33, %c0_34], %74 {strides = array<i32>} : memref<8x128xf32, #tpu.memory_space<vmem>>, vector<8x128xf32>,
    return
  }
  func.func @transform_0(%arg0: i32) -> (i32, i32) {
    %c0_i32 = arith.constant 0 : i32
    %c0_i32_0 = arith.constant 0 : i32
    return %arg0, %c0_i32 : i32, i32
  }
  func.func @transform_1(%arg0: i32) -> (i32, i32) {
    %c0_i32 = arith.constant 0 : i32
    %c0_i32_0 = arith.constant 0 : i32
    %c0_i32_1 = arith.constant 0 : i32
    return %c0_i32, %c0_i32_0 : i32, i32
  }
  func.func @transform_2(%arg0: i32) -> (i32, i32) {
    %c0_i32 = arith.constant 0 : i32
    %c0_i32_0 = arith.constant 0 : i32
    %c0_i32_1 = arith.constant 0 : i32
    return %c0_i32, %c0_i32_0 : i32, i32
  }
  func.func @transform_3(%arg0: i32) -> (i32, i32) {
    %c0_i32 = arith.constant 0 : i32
    %c0_i32_0 = arith.constant 0 : i32
    %c0_i32_1 = arith.constant 0 : i32
    return %c0_i32, %c0_i32_0 : i32, i32
  }
  func.func @transform_4(%arg0: i32) -> (i32, i32) {
    %c0_i32 = arith.constant 0 : i32
    %c0_i32_0 = arith.constant 0 : i32
    return %arg0, %c0_i32 : i32, i32
  }
  func.func @transform_5(%arg0: i32) -> (i32, i32) {
    %c0_i32 = arith.constant 0 : i32
    %c0_i32_0 = arith.constant 0 : i32
    return %arg0, %c0_i32 : i32, i32
  }
}

</mosaic_0001>

<bundles_post_ra>
// kernel: tpu_custom_call.1
= control target key start
LH: loop header
LB: loop body
LE: loop exit
PB: predicated region body
PF: predicated region fallthrough
CT: control target
= control target key end

     0   :  { %11 = vsyncpa [#allocation3], 0  ;;  %s2893_s0 = inlined_call_operand.vmem [shape: f32[256,16], index: 0, kind: input, shape index: {}]   ;;  %s2894_s1 = inlined_call_operand.hbm [shape: bf16[1040,128], index: 1, kind: input, shape index: {}]   ;;  %s2895_s2 = inlined_call_operand.vmem [shape: bf16[128,256], index: 2, kind: input, shape index: {}]   ;;  %s2896_s3 = inlined_call_operand.vmem [shape: f32[9,256], index: 3, kind: input, shape index: {}]   ;;  %s2897_s4 = inlined_call_operand.hbm [shape: f32[16,256], index: 4, kind: output, shape index: {0}]   ;;  %s2898_s5 = inlined_call_operand.hbm [shape: f32[16,128], index: 5, kind: output, shape index: {1}]  }
   0x1   :  { %12 = vsyncpa [#allocation4], 0 }
   0x2   :  { %14 = vsyncpa [#allocation4 + $0x1], 0 }
   0x3   :  { %15 = vsyncpa [#allocation7], 0 }
   0x4   :  { %17 = vsyncpa [#allocation7 + $0x1], 0  ;;  %s2578_s18 = smov 0   ;;  %s2580_s19 = smov 0  }
   0x5   :  { %s2582_s20 = smov 0   ;;  %s2584_s21 = smov 0  }
   0x6 LB: > { %s2599_s22 = sadd.s32 4294967295, %s2538_s21   ;;  %s1874_s23 = sadd.s32 4294967294, %s2538_s21   ;;  %s2538_s21 = sphi %s2584_s21, %s2914_s21   ;;  %s2534_s20 = sphi %s2582_s20, %s2913_s20   ;;  %s2530_s19 = sphi %s2580_s19, %s2912_s19   ;;  %s2526_s18 = sphi %s2578_s18, %s2911_s18  }
   0x7   : > { %s2603_s24 = sadd.s32 1, %s2538_s21   ;;  %s119_s25 = sadd.s32 1, %s2534_s20 }
   0x8   : > { %s116_s26 = ssub.s32 %s2538_s21, %s2603_s24  ;;  %p129_p0 = scmp.ne.s32.totalorder %s2534_s20, %s2530_s19 }
   0x9   : > { %p117_p1 = scmp.eq.s32.totalorder %s116_s26, 0  ;;  %p130_p2 = scmp.eq.s32.totalorder %s2599_s22, 1 }
   0xa   : > { %p135_p3 = scmp.ne.s32.totalorder %s2530_s19, %s2526_s18  ;;  %p136_p4 = scmp.eq.s32.totalorder %s1874_s23, 1 }
   0xb   : > { %s2614_s27 = scalar_select %p117_p1, %s2534_s20, %s119_s25  }
   0xc   : > { %p2616_p5 = por %p130_p2, %p129_p0  ;;  %p2620_p6 = por %p136_p4, %p135_p3 }
   0xd   : > { %p1875_p7 = scmp.ge.s32.totalorder %s2538_s21, 1  ;;  %p169_p8 = scmp.lt.s32.totalorder %s2538_s21, 3 }
   0xe   : > { %s2902_s28 = scalar_select %p2616_p5, 1, 0 }
   0xf   : > { %s2903_s29 = scalar_select %p2620_p6, 1, 0 }
  0x10   : > { %p2899_p9 = scmp.eq.s32.totalorder %s2599_s22, 0  ;;  %p2627_p10 = pnand %p1875_p7, %p169_p8 }
  0x11   : > { %s2540_s6 = smov [#allocation2]   ;;  %s2412_s11 = scalar_lea.hbm %s2894_s1, 8320 }
  0x12   : > { %s2904_s30 = scalar_select %p2627_p10, 1, 0 }
  0x13   : > { %s181_s7 = sshll.u32 %s2540_s6, 4  ;;  %p2270_p11 = pneg %p2627_p10  ;;  %s182_s7 = int_to_ptr.vmem [resolvable:$true] %s181_s7 }
  0x14   : > { %p2413_p13 = scmp.ne.s32.totalorder %s2894_s1, %s2412_s11  ;;  %p2419_p3 = scmp.lt.u32.totalorder %s2412_s11, %s2894_s1 }
  0x15   : > { %p2635_p12 = pnand %p2899_p9, %p2270_p11 }
  0x17   : > { %p2414_p0 = pneg %p2635_p12 }
  0x19   : > { %p2415_p1 = pnand %p2414_p0, %p2413_p13 }
  0x1b   : > { %p2416_p2 = pneg %p2415_p1 }
  0x1d   : > { %p2421_p4 = pnand %p2419_p3, %p2416_p2 }
  0x1f   : > { %2424 = shalt.err (!%p2421_p4)
}
  0x20   : > { %s2425_s16 = scalar_lea.vmem %s182_s7, 8320  ;;  %p2433_p9 = scmp.lt.s32.totalorder %s182_s7, %s182_s7 }
  0x21   : > { %p2426_p7 = scmp.ne.s32.totalorder %s182_s7, %s2425_s16  ;;  %p2434_p6 = scmp.lt.s32.totalorder %s2425_s16, %s2425_s16 }
  0x23   : > { %p2428_p8 = pnand %p2426_p7, %p2414_p0  ;;  %p2435_p5 = por %p2434_p6, %p2433_p9 }
  0x25   : > { %p2429_p11 = pneg %p2428_p8 }
  0x27   : > { %p2436_p10 = pnand %p2435_p5, %p2429_p11 }
  0x29   : > { %2439 = shalt.err (!%p2436_p10)
}
  0x2a   : > { %s2541_s17 = smov 64   ;;  %s2542_s23 = smov 4  }
  0x2b   : > { %2273 = dma.hbm_to_vmem [thread:$0]  (!%p2635_p12), %s2894_s1, 8320, %s182_s7, [#allocation3], %s2541_s17, %s2541_s17, %s2542_s23  }
  0x2c   : > { %p2906_p13 = scmp.ne.s32.totalorder %s2904_s30, 0 }
  0x2d   : > { %p2907_p1 = scmp.eq.s32.totalorder (!%p2906_p13), %s2599_s22, 0 }
  0x2e   : > { %212 = sbr.rel (%p2906_p13) target bundleno = 2100 (0x834), region = 36 }
  0x35   : > { %2513 = dma.done.wait (%p2907_p1), [#allocation3], 8320   ;;  %p2908_p0 = pmov %p2907_p1 }
  0x36   : > { %s1882_s6 = sshll.u32 %s2599_s22, 4  ;;  %v2322_v0 = vld [vmem:[#allocation2] sm:$0xff]   ;;  %vm291_vm0 = vcmask 130048   ;;  %v2323_v14 = vld [vmem:[#allocation2 + $0x8] sm:$0xff]   ;;  %v2324_v15 = vld [vmem:[#allocation2 + $0x10] sm:$0xff]   ;;  %v281_v39 = vlaneseq  ;;  %vm2544_vm1 = vmmov 0  }
  0x37   : > { %2515 = vsyncadd (%p2908_p0), [#allocation3], 4294958976  ;;  %p246_p5 = scmp.lt.s32.totalorder %s1882_s6, 31  ;;  %2088 = vmatprep.subr.bf16.mxu0 %v2322_v0  ;;  %2106 = vmatprep.subr.bf16.mxu1 %v2323_v14  ;;  %v2325_v18 = vld [vmem:[#allocation2 + $0x18] sm:$0xff]   ;;  %v2326_v21 = vld [vmem:[#allocation2 + $0x20] sm:$0xff]   ;;  %vm1088_vm2 = vcmask 1041409  }
  0x38   : > { %2089 = vmatpush3.bf16.msra.mxu0 %v2322_v0  ;;  %2107 = vmatpush3.bf16.msra.mxu1 %v2323_v14  ;;  %v2327_v24 = vld [vmem:[#allocation2 + $0x28] sm:$0xff]   ;;  %v2328_v29 = vld [vmem:[#allocation2 + $0x30] sm:$0xff]   ;;  %v2329_v31 = vld [vmem:[#allocation2 + $0x38] sm:$0xff]   ;;  %v2691_v40 = vshrl.u32 %v281_v39, 7  ;;  %vm1090_vm3 = vcmask 1042434   ;;  %vm1092_vm4 = vcmask 1043459  }
  0x39   : > { %s2916_s6 = smov (!%p246_p5, %s1882_s6), 31  ;;  %2108 = vmatprep.subr.bf16.mxu1 %v2324_v15  ;;  %v2330_v32 = vld [vmem:[#allocation2 + $0x40] sm:$0xff]   ;;  %v2331_v33 = vld [vmem:[#allocation2 + $0x48] sm:$0xff]   ;;  %v2332_v34 = vld [vmem:[#allocation2 + $0x50] sm:$0xff]   ;;  %vm1094_vm5 = vcmask 1044484   ;;  %vm1096_vm6 = vcmask 1045509  }
  0x3a   : > { %s1883_s9 = sshll.u32 %s2916_s6, 3  ;;  %2138 = vmatprep.subr.bf16.mxu0 %v2331_v33  ;;  %v2333_v35 = vld [vmem:[#allocation2 + $0x58] sm:$0xff]   ;;  %v2334_v36 = vld [vmem:[#allocation2 + $0x60] sm:$0xff]   ;;  %v2335_v37 = vld [vmem:[#allocation2 + $0x68] sm:$0xff]   ;;  %v283_v41 = vsub.s32 0, %v2691_v40  ;;  %vm1098_vm7 = vcmask 1046534  }
  0x3b   : > { %s2665_s11 = scalar_lea.vmem %s2893_s0, %s1883_s9  ;;  %v2336_v38 = vld [vmem:[#allocation2 + $0x70] sm:$0xff]   ;;  %v2697_v42 = vld [vmem:[%s2896_s3] sm:$0xff]  ;;  %vm1100_vm8 = vcmask 1047559   ;;  %s2812_s14 = sand.u32 1, %s2530_s19  }
  0x3c   : > { %v255_v1 = vld [vmem:[%s2665_s11] sm:$0xff]  ;;  %v256_v2 = vld [vmem:[%s2665_s11 + $0x8] sm:$0xff]  ;;  %v257_v3 = vld [vmem:[%s2665_s11 + $0x10] sm:$0xff]  ;;  %2109 = vmatpush3.bf16.msra.mxu1 %v2324_v15  ;;  %v284_v43 = vrot.slane %v2697_v42, %v283_v41  ;;  %s1880_s17 = sshll.u32 %s2812_s14, 4  ;;  %s1981_s25 = sshll.u32 %s2599_s22, 8 }
  0x3d   : > { %v273_v4 = vpack.c.bf16 %v256_v2, %v255_v1  ;;  %v258_v5 = vld [vmem:[%s2665_s11 + $0x18] sm:$0xff]  ;;  %v259_v6 = vld [vmem:[%s2665_s11 + $0x20] sm:$0xff]  ;;  %v260_v7 = vld [vmem:[%s2665_s11 + $0x28] sm:$0xff]  ;;  %2110 = vmatprep.subr.bf16.mxu1 %v2325_v18  ;;  %s237_s23 = scalar_lea.vmem [#allocation5], %s1880_s17  ;;  %s2822_s9 = scalar_lea.hbm %s2897_s4, %s1981_s25 }
  0x3e   : > { %v274_v8 = vpack.c.bf16 %v258_v5, %v257_v3  ;;  %v275_v9 = vpack.c.bf16 %v260_v7, %v259_v6  ;;  %v261_v10 = vld [vmem:[%s2665_s11 + $0x30] sm:$0xff]  ;;  %v262_v11 = vld [vmem:[%s2665_s11 + $0x38] sm:$0xff]  ;;  %v263_v12 = vld [vmem:[%s2665_s11 + $0x40] sm:$0xff]  ;;  %s1758_s10 = sshll.u32 %s237_s23, 4  ;;  %s1739_s8 = scalar_lea.sflag [#allocation4], %s2812_s14  ;;  %s1759_s10 = int_to_ptr.vmem [resolvable:$true] %s1758_s10 }
  0x3f   : > { %2090 = vmatprep.mubr.msk.bf16.mxu0 %vm291_vm0, %v273_v4  ;;  %v264_v13 = vld [vmem:[%s2665_s11 + $0x48] sm:$0xff]  ;;  %v276_v16 = vpack.c.bf16 %v262_v11, %v261_v10  ;;  %v265_v19 = vld [vmem:[%s2665_s11 + $0x50] sm:$0xff]  ;;  %v266_v20 = vld [vmem:[%s2665_s11 + $0x58] sm:$0xff]  ;;  %p2909_p9 = scmp.ne.s32.totalorder %s2902_s28, 0  ;;  %s2546_s30 = smov [#allocation5]  }
  0x40   : > { %2091 = vmatmul.mubr.msk.bf16.vlgmr.msra.gmra.mrb[0].mxu0 %vm291_vm0, %v274_v8  ;;  %v277_v17 = vpack.c.bf16 %v264_v13, %v263_v12  ;;  %v267_v22 = vld [vmem:[%s2665_s11 + $0x60] sm:$0xff]  ;;  %v268_v23 = vld [vmem:[%s2665_s11 + $0x68] sm:$0xff]  ;;  %v278_v25 = vpack.c.bf16 %v266_v20, %v265_v19  ;;  %2111 = vmatpush3.bf16.msra.mxu1 %v2325_v18  ;;  %v269_v27 = vld [vmem:[%s2665_s11 + $0x70] sm:$0xff]  ;;  %s2444_s7 = sshll.u32 %s2546_s30, 4  ;;  %s2445_s7 = int_to_ptr.vmem [resolvable:$false] %s2444_s7 }
  0x41   : > { %2094 = vmatprep.mubr.msk.bf16.mxu0 %vm291_vm0, %v275_v9  ;;  %v279_v26 = vpack.c.bf16 %v268_v23, %v267_v22  ;;  %2112 = vmatprep.subr.bf16.mxu1 %v2326_v21  ;;  %v270_v28 = vld [vmem:[%s2665_s11 + $0x78] sm:$0xff]  ;;  %v2340_v39 = vld [vmem:[#allocation2 + $0x90] sm:$0xff]   ;;  %s2440_s11 = scalar_lea.vmem %s1759_s10, 256  ;;  %s2446_s12 = scalar_lea.vmem %s2445_s7, 512 }
  0x42   : > { %v280_v30 = vpack.c.bf16 %v270_v28, %v269_v27  ;;  %2139 = vmatpush3.bf16.msra.mxu0 %v2331_v33  ;;  %v2341_v41 = vld [vmem:[#allocation2 + $0x98] sm:$0xff]   ;;  %p2441_p6 = scmp.ne.s32.totalorder %s1759_s10, %s2440_s11  ;;  %p2447_p2 = scmp.lt.s32.totalorder %s1759_s10, %s2445_s7 }
  0x43   : > { %2140 = vmatprep.subr.bf16.mxu0 %v2332_v34  ;;  %p2448_p3 = scmp.lt.s32.totalorder %s2446_s12, %s2440_s11 }
  0x44   : > { %2113 = vmatpush3.bf16.msra.mxu1 %v2326_v21  ;;  %p2442_p10 = pnand %p2441_p6, %p2909_p9 }
  0x45   : > { %2114 = vmatprep.subr.bf16.mxu1 %v2327_v24  ;;  %p2449_p4 = por %p2448_p3, %p2447_p2 }
  0x46   : > { %2141 = vmatpush3.bf16.msra.mxu0 %v2332_v34  ;;  %p2443_p12 = pneg %p2442_p10 }
  0x47   : > { %2142 = vmatprep.subr.bf16.mxu0 %v2333_v35 }
  0x48   : > { %2095 = vmatmul.mubr.msk.bf16.gmra.mrb[4].mxu0 %vm291_vm0, %v276_v16  ;;  %2115 = vmatpush3.bf16.msra.mxu1 %v2327_v24  ;;  %p2450_p7 = pnand %p2449_p4, %p2443_p12 }
  0x49   : > { %2098 = vmatprep.mubr.msk.bf16.mxu0 %vm291_vm0, %v277_v17  ;;  %2116 = vmatprep.subr.bf16.mxu1 %v2328_v29 }
  0x4a   : > { %2143 = vmatpush3.bf16.msra.mxu0 %v2333_v35 }
  0x4b   : > { %2144 = vmatprep.subr.bf16.mxu0 %v2334_v36 }
  0x4c   : > { %2117 = vmatpush3.bf16.msra.mxu1 %v2328_v29 }
  0x4d   : > { %2118 = vmatprep.subr.bf16.mxu1 %v2329_v31 }
  0x4e   : > { %2145 = vmatpush3.bf16.msra.mxu0 %v2334_v36  ;;  %v2337_v36 = vld [vmem:[#allocation2 + $0x78] sm:$0xff]  }
  0x4f   : > { %2146 = vmatprep.subr.bf16.mxu0 %v2335_v37 }
  0x50   : > { %2099 = vmatmul.mubr.msk.bf16.gmra.mrb[8].mxu0 %vm291_vm0, %v278_v25  ;;  %2119 = vmatpush3.bf16.msra.mxu1 %v2329_v31 }
  0x51   : > { %2102 = vmatprep.mubr.msk.bf16.mxu0 %vm291_vm0, %v279_v26  ;;  %2120 = vmatprep.subr.bf16.mxu1 %v2330_v32 }
  0x52   : > { %2147 = vmatpush3.bf16.msra.mxu0 %v2335_v37  ;;  %v2338_v37 = vld [vmem:[#allocation2 + $0x80] sm:$0xff]  }
  0x53   : > { %2148 = vmatprep.subr.bf16.mxu0 %v2336_v38 }
  0x54   : > { %2121 = vmatpush3.bf16.msra.mxu1 %v2330_v32 }
  0x56   : > { %2149 = vmatpush3.bf16.msra.mxu0 %v2336_v38  ;;  %v2339_v38 = vld [vmem:[#allocation2 + $0x88] sm:$0xff]  }
  0x57   : > { %2150 = vmatprep.subr.bf16.mxu0 %v2337_v36  ;;  %2170 = vmatprep.subr.bf16.mxu1 %v2339_v38 }
  0x58   : > { %2103 = vmatmul.mubr.msk.bf16.gmra.mrb[12].mxu0 %vm291_vm0, %v280_v30 }
  0x5a   : > { %2151 = vmatpush3.bf16.msra.mxu0 %v2337_v36 }
  0x5b   : > { %2152 = vmatprep.subr.bf16.mxu0 %v2338_v37 }
  0x5e   : > { %2153 = vmatpush3.bf16.msra.mxu0 %v2338_v37 }
 0x113   : > { %v2092_v44 = vpop.f32.mrb[0].mxu0 }
 0x114   : > { %v359_v45 = vadd.f32 %v2092_v44, %v284_v43  ;;  %v350_v46 = vpop.f32.mrb[1].mxu0  ;;  %v2343_v44 = vld [vmem:[#allocation2 + $0xa8] sm:$0xff]  }
 0x115   : > { %v351_v47 = vadd.f32 %v350_v46, %v284_v43  ;;  %v2093_v48 = vpop.f32.mrb[2].mxu0  ;;  %v455_v46 = vsub.s32 1, %v2691_v40 }
 0x116   : > { %v362_v49 = vadd.f32 %v2093_v48, %v284_v43  ;;  %v353_v50 = vpop.f32.mrb[3].mxu0  ;;  %v415_v52 = vmax.f32 %v359_v45, 0.0  ;;  %v2344_v45 = vld [vmem:[#allocation2 + $0xb0] sm:$0xff]  }
 0x117   : > { %v354_v51 = vadd.f32 %v353_v50, %v284_v43  ;;  %v413_v54 = vmax.f32 %v351_v47, 0.0  ;;  %v456_v47 = vrot.slane %v2697_v42, %v455_v46 }
 0x118   : > { %v416_v53 = vmax.f32 %v362_v49, 0.0 }
 0x119   : > { %v414_v55 = vmax.f32 %v354_v51, 0.0 }
 0x11a   : > { %v446_v56 = vpack.c.bf16 %v416_v53, %v415_v52 }
 0x11b   : > { %v2096_v57 = vpop.f32.mrb[4].mxu0  ;;  %v445_v58 = vpack.c.bf16 %v414_v55, %v413_v54 }
 0x11c   : > { %v375_v59 = vadd.f32 %v2096_v57, %v284_v43  ;;  %v366_v60 = vpop.f32.mrb[5].mxu0 }
 0x11d   : > { %v367_v61 = vadd.f32 %v366_v60, %v284_v43  ;;  %v2097_v62 = vpop.f32.mrb[6].mxu0  ;;  %2122 = vmatprep.mubr.bf16.mxu1 %v445_v58 }
 0x11e   : > { %v378_v63 = vadd.f32 %v2097_v62, %v284_v43  ;;  %v369_v0 = vpop.f32.mrb[7].mxu0  ;;  %2123 = vmatmul.mubr.bf16.vlgmr.msra.gmra.mrb[0].mxu1 %v446_v56  ;;  %v419_v2 = vmax.f32 %v375_v59, 0.0 }
 0x11f   : > { %v370_v1 = vadd.f32 %v369_v0, %v284_v43  ;;  %v417_v4 = vmax.f32 %v367_v61, 0.0  ;;  %2171 = vmatpush3.bf16.msra.mxu1 %v2339_v38 }
 0x120   : > { %v420_v3 = vmax.f32 %v378_v63, 0.0  ;;  %2172 = vmatprep.subr.bf16.mxu1 %v2340_v39 }
 0x121   : > { %v418_v5 = vmax.f32 %v370_v1, 0.0 }
 0x122   : > { %v448_v6 = vpack.c.bf16 %v420_v3, %v419_v2 }
 0x123   : > { %v447_v7 = vpack.c.bf16 %v418_v5, %v417_v4  ;;  %v2100_v8 = vpop.f32.mrb[8].mxu0  ;;  %2173 = vmatpush3.bf16.msra.mxu1 %v2340_v39 }
 0x124   : > { %v391_v9 = vadd.f32 %v2100_v8, %v284_v43  ;;  %v382_v10 = vpop.f32.mrb[9].mxu0  ;;  %2174 = vmatprep.subr.bf16.mxu1 %v2341_v41 }
 0x125   : > { %v383_v11 = vadd.f32 %v382_v10, %v284_v43  ;;  %v2101_v12 = vpop.f32.mrb[10].mxu0  ;;  %2126 = vmatprep.mubr.bf16.mxu1 %v447_v7 }
 0x126   : > { %v394_v13 = vadd.f32 %v2101_v12, %v284_v43  ;;  %v385_v14 = vpop.f32.mrb[11].mxu0  ;;  %2127 = vmatmul.mubr.bf16.gmra.mrb[4].mxu1 %v448_v6  ;;  %v423_v16 = vmax.f32 %v391_v9, 0.0 }
 0x127   : > { %v386_v15 = vadd.f32 %v385_v14, %v284_v43  ;;  %v421_v18 = vmax.f32 %v383_v11, 0.0  ;;  %2175 = vmatpush3.bf16.msra.mxu1 %v2341_v41  ;;  %v2345_v41 = vld [vmem:[#allocation2 + $0xb8] sm:$0xff]  }
 0x128   : > { %v424_v17 = vmax.f32 %v394_v13, 0.0 }
 0x129   : > { %v422_v19 = vmax.f32 %v386_v15, 0.0 }
 0x12a   : > { %v450_v20 = vpack.c.bf16 %v424_v17, %v423_v16 }
 0x12b   : > { %v449_v21 = vpack.c.bf16 %v422_v19, %v421_v18  ;;  %v2104_v22 = vpop.f32.mrb[12].mxu0 }
 0x12c   : > { %v407_v23 = vadd.f32 %v2104_v22, %v284_v43  ;;  %v398_v24 = vpop.f32.mrb[13].mxu0 }
 0x12d   : > { %v399_v25 = vadd.f32 %v398_v24, %v284_v43  ;;  %v2105_v26 = vpop.f32.mrb[14].mxu0  ;;  %2130 = vmatprep.mubr.bf16.mxu1 %v449_v21 }
 0x12e   : > { %v410_v27 = vadd.f32 %v2105_v26, %v284_v43  ;;  %v401_v28 = vpop.f32.mrb[15].mxu0  ;;  %2131 = vmatmul.mubr.bf16.gmra.mrb[8].mxu1 %v450_v20  ;;  %v427_v30 = vmax.f32 %v407_v23, 0.0 }
 0x12f   : > { %v402_v29 = vadd.f32 %v401_v28, %v284_v43  ;;  %v425_v32 = vmax.f32 %v399_v25, 0.0  ;;  %v2342_v43 = vld [vmem:[#allocation2 + $0xa0] sm:$0xff]  }
 0x130   : > { %v428_v31 = vmax.f32 %v410_v27, 0.0  ;;  %2176 = vmatprep.subr.bf16.mxu1 %v2342_v43 }
 0x131   : > { %v426_v33 = vmax.f32 %v402_v29, 0.0  ;;  %2177 = vmatpush3.bf16.msra.mxu1 %v2342_v43  ;;  %v2346_v43 = vld [vmem:[#allocation2 + $0xc0] sm:$0xff]  }
 0x132   : > { %v452_v34 = vpack.c.bf16 %v428_v31, %v427_v30  ;;  %2178 = vmatprep.subr.bf16.mxu1 %v2343_v44 }
 0x133   : > { %v451_v35 = vpack.c.bf16 %v426_v33, %v425_v32 }
 0x135   : > { %2134 = vmatprep.mubr.bf16.mxu1 %v451_v35  ;;  %2179 = vmatpush3.bf16.msra.mxu1 %v2343_v44  ;;  %v644_v44 = vsub.s32 2, %v2691_v40 }
 0x136   : > { %2135 = vmatmul.mubr.bf16.gmra.mrb[12].mxu1 %v452_v34  ;;  %2180 = vmatprep.subr.bf16.mxu1 %v2344_v45 }
 0x139   : > { %2181 = vmatpush3.bf16.msra.mxu1 %v2344_v45  ;;  %v645_v45 = vrot.slane %v2697_v42, %v644_v44  ;;  %v2350_v44 = vld [vmem:[#allocation2 + $0xe0] sm:$0xff]  }
 0x13a   : > { %2182 = vmatprep.subr.bf16.mxu1 %v2345_v41 }
 0x13d   : > { %2183 = vmatpush3.bf16.msra.mxu1 %v2345_v41  ;;  %v2348_v41 = vld [vmem:[#allocation2 + $0xd0] sm:$0xff]  }
 0x13e   : > { %2184 = vmatprep.subr.bf16.mxu1 %v2346_v43 }
 0x141   : > { %2185 = vmatpush3.bf16.msra.mxu1 %v2346_v43  ;;  %v2349_v43 = vld [vmem:[#allocation2 + $0xd8] sm:$0xff]  }
 0x1f1   : > { %v2124_v48 = vpop.f32.mrb[0].mxu1 }
 0x1f2   : > { %v548_v49 = vadd.f32 %v2124_v48, %v456_v47  ;;  %v539_v50 = vpop.f32.mrb[1].mxu1 }
 0x1f3   : > { %v540_v51 = vadd.f32 %v539_v50, %v456_v47  ;;  %v2125_v52 = vpop.f32.mrb[2].mxu1 }
 0x1f4   : > { %v551_v53 = vadd.f32 %v2125_v52, %v456_v47  ;;  %v542_v54 = vpop.f32.mrb[3].mxu1  ;;  %v604_v56 = vmax.f32 %v548_v49, 0.0 }
 0x1f5   : > { %v543_v55 = vadd.f32 %v542_v54, %v456_v47  ;;  %v602_v58 = vmax.f32 %v540_v51, 0.0 }
 0x1f6   : > { %v605_v57 = vmax.f32 %v551_v53, 0.0 }
 0x1f7   : > { %v603_v59 = vmax.f32 %v543_v55, 0.0 }
 0x1f8   : > { %v635_v60 = vpack.c.bf16 %v605_v57, %v604_v56 }
 0x1f9   : > { %v634_v61 = vpack.c.bf16 %v603_v59, %v602_v58  ;;  %v2128_v62 = vpop.f32.mrb[4].mxu1 }
 0x1fa   : > { %v564_v63 = vadd.f32 %v2128_v62, %v456_v47  ;;  %v555_v0 = vpop.f32.mrb[5].mxu1 }
 0x1fb   : > { %v556_v1 = vadd.f32 %v555_v0, %v456_v47  ;;  %v2129_v2 = vpop.f32.mrb[6].mxu1  ;;  %2154 = vmatprep.mubr.bf16.mxu0 %v634_v61 }
 0x1fc   : > { %v567_v3 = vadd.f32 %v2129_v2, %v456_v47  ;;  %v558_v4 = vpop.f32.mrb[7].mxu1  ;;  %2155 = vmatmul.mubr.bf16.vlgmr.msra.gmra.mrb[16].mxu0 %v635_v60  ;;  %v608_v6 = vmax.f32 %v564_v63, 0.0 }
 0x1fd   : > { %v559_v5 = vadd.f32 %v558_v4, %v456_v47  ;;  %v606_v8 = vmax.f32 %v556_v1, 0.0 }
 0x1fe   : > { %v609_v7 = vmax.f32 %v567_v3, 0.0 }
 0x1ff   : > { %v607_v9 = vmax.f32 %v559_v5, 0.0 }
 0x200   : > { %v637_v10 = vpack.c.bf16 %v609_v7, %v608_v6 }
 0x201   : > { %v636_v11 = vpack.c.bf16 %v607_v9, %v606_v8  ;;  %v2132_v12 = vpop.f32.mrb[8].mxu1 }
 0x202   : > { %v580_v13 = vadd.f32 %v2132_v12, %v456_v47  ;;  %v571_v14 = vpop.f32.mrb[9].mxu1 }
 0x203   : > { %v572_v15 = vadd.f32 %v571_v14, %v456_v47  ;;  %v2133_v16 = vpop.f32.mrb[10].mxu1  ;;  %2158 = vmatprep.mubr.bf16.mxu0 %v636_v11 }
 0x204   : > { %v583_v17 = vadd.f32 %v2133_v16, %v456_v47  ;;  %v574_v18 = vpop.f32.mrb[11].mxu1  ;;  %2159 = vmatmul.mubr.bf16.gmra.mrb[20].mxu0 %v637_v10  ;;  %v612_v20 = vmax.f32 %v580_v13, 0.0 }
 0x205   : > { %v575_v19 = vadd.f32 %v574_v18, %v456_v47  ;;  %v610_v22 = vmax.f32 %v572_v15, 0.0 }
 0x206   : > { %v613_v21 = vmax.f32 %v583_v17, 0.0 }
 0x207   : > { %v611_v23 = vmax.f32 %v575_v19, 0.0 }
 0x208   : > { %v639_v24 = vpack.c.bf16 %v613_v21, %v612_v20 }
 0x209   : > { %v638_v25 = vpack.c.bf16 %v611_v23, %v610_v22  ;;  %v2136_v26 = vpop.f32.mrb[12].mxu1 }
 0x20a   : > { %v596_v27 = vadd.f32 %v2136_v26, %v456_v47  ;;  %v587_v28 = vpop.f32.mrb[13].mxu1 }
 0x20b   : > { %v588_v29 = vadd.f32 %v587_v28, %v456_v47  ;;  %v2137_v30 = vpop.f32.mrb[14].mxu1  ;;  %2162 = vmatprep.mubr.bf16.mxu0 %v638_v25 }
 0x20c   : > { %v599_v31 = vadd.f32 %v2137_v30, %v456_v47  ;;  %v590_v32 = vpop.f32.mrb[15].mxu1  ;;  %2163 = vmatmul.mubr.bf16.gmra.mrb[24].mxu0 %v639_v24  ;;  %v616_v34 = vmax.f32 %v596_v27, 0.0 }
 0x20d   : > { %v591_v33 = vadd.f32 %v590_v32, %v456_v47  ;;  %v614_v36 = vmax.f32 %v588_v29, 0.0 }
 0x20e   : > { %v617_v35 = vmax.f32 %v599_v31, 0.0 }
 0x20f   : > { %v615_v37 = vmax.f32 %v591_v33, 0.0 }
 0x210   : > { %v641_v38 = vpack.c.bf16 %v617_v35, %v616_v34 }
 0x211   : > { %v640_v39 = vpack.c.bf16 %v615_v37, %v614_v36 }
 0x213   : > { %2166 = vmatprep.mubr.bf16.mxu0 %v640_v39  ;;  %v2543_v39 = vmov 0.0  }
 0x214   : > { %2167 = vmatmul.mubr.bf16.gmra.mrb[28].mxu0 %v641_v38  ;;  %v2347_v38 = vld [vmem:[#allocation2 + $0xc8] sm:$0xff]   ;;  %2202 = vmatprep.subr.bf16.mxu0 %v2543_v39 }
 0x215   : > { %2222 = vmatprep.subr.bf16.mxu1 %v2543_v39  ;;  %2203 = vmatpush3.bf16.msra.mxu0 %v2347_v38 }
 0x216   : > { %2204 = vmatprep.subr.bf16.mxu0 %v2543_v39  ;;  %2218 = vmatprep.mubr.msk.bf16.mxu0 %vm2544_vm1, %v2543_v39 }
 0x219   : > { %2205 = vmatpush3.bf16.msra.mxu0 %v2348_v41 }
 0x21a   : > { %2206 = vmatprep.subr.bf16.mxu0 %v2543_v39 }
 0x21d   : > { %2207 = vmatpush3.bf16.msra.mxu0 %v2349_v43 }
 0x21e   : > { %2208 = vmatprep.subr.bf16.mxu0 %v2543_v39 }
 0x221   : > { %2209 = vmatpush3.bf16.msra.mxu0 %v2350_v44 }
 0x222   : > { %2210 = vmatprep.subr.bf16.mxu0 %v2543_v39 }
 0x2cf   : > { %v2156_v46 = vpop.f32.mrb[16].mxu0 }
 0x2d0   : > { %v737_v47 = vadd.f32 %v2156_v46, %v645_v45  ;;  %v728_v48 = vpop.f32.mrb[17].mxu0  ;;  %v2352_v46 = vld [vmem:[#allocation2 + $0xf0] sm:$0xff]  }
 0x2d1   : > { %v729_v49 = vadd.f32 %v728_v48, %v645_v45  ;;  %v2157_v50 = vpop.f32.mrb[18].mxu0  ;;  %v2354_v48 = vld [vmem:[#allocation2 + $0x100] sm:$0xff]  }
 0x2d2   : > { %v740_v51 = vadd.f32 %v2157_v50, %v645_v45  ;;  %v731_v52 = vpop.f32.mrb[19].mxu0  ;;  %v793_v54 = vmax.f32 %v737_v47, 0.0  ;;  %v2353_v47 = vld [vmem:[#allocation2 + $0xf8] sm:$0xff]   ;;  %v2356_v50 = vld [vmem:[#allocation2 + $0x110] sm:$0xff]  }
 0x2d3   : > { %v732_v53 = vadd.f32 %v731_v52, %v645_v45  ;;  %v791_v56 = vmax.f32 %v729_v49, 0.0  ;;  %v2355_v49 = vld [vmem:[#allocation2 + $0x108] sm:$0xff]   ;;  %v2358_v52 = vld [vmem:[#allocation2 + $0x120] sm:$0xff]  }
 0x2d4   : > { %v794_v55 = vmax.f32 %v740_v51, 0.0  ;;  %v2357_v51 = vld [vmem:[#allocation2 + $0x118] sm:$0xff]  }
 0x2d5   : > { %v792_v57 = vmax.f32 %v732_v53, 0.0  ;;  %v2359_v53 = vld [vmem:[#allocation2 + $0x128] sm:$0xff]  }
 0x2d6   : > { %v824_v58 = vpack.c.bf16 %v794_v55, %v793_v54  ;;  %v2360_v54 = vld [vmem:[#allocation2 + $0x130] sm:$0xff]   ;;  %v2361_v55 = vld [vmem:[#allocation2 + $0x138] sm:$0xff]  }
 0x2d7   : > { %v823_v59 = vpack.c.bf16 %v792_v57, %v791_v56  ;;  %v2160_v60 = vpop.f32.mrb[20].mxu0  ;;  %v833_v56 = vsub.s32 3, %v2691_v40 }
 0x2d8   : > { %v753_v61 = vadd.f32 %v2160_v60, %v645_v45  ;;  %v744_v62 = vpop.f32.mrb[21].mxu0 }
 0x2d9   : > { %v745_v63 = vadd.f32 %v744_v62, %v645_v45  ;;  %v2161_v0 = vpop.f32.mrb[22].mxu0  ;;  %2186 = vmatprep.mubr.bf16.mxu1 %v823_v59  ;;  %v2727_v57 = vrot.slane %v2697_v42, %v833_v56 }
 0x2da   : > { %v756_v1 = vadd.f32 %v2161_v0, %v645_v45  ;;  %v747_v2 = vpop.f32.mrb[23].mxu0  ;;  %2187 = vmatmul.mubr.bf16.vlgmr.msra.gmra.mrb[16].mxu1 %v824_v58  ;;  %v797_v4 = vmax.f32 %v753_v61, 0.0 }
 0x2db   : > { %v748_v3 = vadd.f32 %v747_v2, %v645_v45  ;;  %v795_v6 = vmax.f32 %v745_v63, 0.0  ;;  %2223 = vmatpush3.bf16.msra.mxu1 %v2355_v49 }
 0x2dc   : > { %v798_v5 = vmax.f32 %v756_v1, 0.0  ;;  %2224 = vmatprep.subr.bf16.mxu1 %v2543_v39 }
 0x2dd   : > { %v796_v7 = vmax.f32 %v748_v3, 0.0 }
 0x2de   : > { %v826_v8 = vpack.c.bf16 %v798_v5, %v797_v4 }
 0x2df   : > { %v825_v9 = vpack.c.bf16 %v796_v7, %v795_v6  ;;  %v2164_v10 = vpop.f32.mrb[24].mxu0  ;;  %2225 = vmatpush3.bf16.msra.mxu1 %v2356_v50 }
 0x2e0   : > { %v769_v11 = vadd.f32 %v2164_v10, %v645_v45  ;;  %v760_v12 = vpop.f32.mrb[25].mxu0  ;;  %2226 = vmatprep.subr.bf16.mxu1 %v2543_v39 }
 0x2e1   : > { %v761_v13 = vadd.f32 %v760_v12, %v645_v45  ;;  %v2165_v14 = vpop.f32.mrb[26].mxu0  ;;  %2190 = vmatprep.mubr.bf16.mxu1 %v825_v9 }
 0x2e2   : > { %v772_v15 = vadd.f32 %v2165_v14, %v645_v45  ;;  %v763_v16 = vpop.f32.mrb[27].mxu0  ;;  %2191 = vmatmul.mubr.bf16.gmra.mrb[20].mxu1 %v826_v8  ;;  %v801_v18 = vmax.f32 %v769_v11, 0.0 }
 0x2e3   : > { %v764_v17 = vadd.f32 %v763_v16, %v645_v45  ;;  %v799_v20 = vmax.f32 %v761_v13, 0.0  ;;  %2227 = vmatpush3.bf16.msra.mxu1 %v2357_v51 }
 0x2e4   : > { %v802_v19 = vmax.f32 %v772_v15, 0.0  ;;  %2228 = vmatprep.subr.bf16.mxu1 %v2543_v39 }
 0x2e5   : > { %v800_v21 = vmax.f32 %v764_v17, 0.0 }
 0x2e6   : > { %v828_v22 = vpack.c.bf16 %v802_v19, %v801_v18 }
 0x2e7   : > { %v827_v23 = vpack.c.bf16 %v800_v21, %v799_v20  ;;  %v2168_v24 = vpop.f32.mrb[28].mxu0  ;;  %2229 = vmatpush3.bf16.msra.mxu1 %v2358_v52 }
 0x2e8   : > { %v785_v25 = vadd.f32 %v2168_v24, %v645_v45  ;;  %v776_v26 = vpop.f32.mrb[29].mxu0  ;;  %2230 = vmatprep.subr.bf16.mxu1 %v2543_v39 }
 0x2e9   : > { %v777_v27 = vadd.f32 %v776_v26, %v645_v45  ;;  %v2169_v28 = vpop.f32.mrb[30].mxu0  ;;  %2194 = vmatprep.mubr.bf16.mxu1 %v827_v23 }
 0x2ea   : > { %v788_v29 = vadd.f32 %v2169_v28, %v645_v45  ;;  %v779_v30 = vpop.f32.mrb[31].mxu0  ;;  %2195 = vmatmul.mubr.bf16.gmra.mrb[24].mxu1 %v828_v22  ;;  %v805_v32 = vmax.f32 %v785_v25, 0.0 }
 0x2eb   : > { %v780_v31 = vadd.f32 %v779_v30, %v645_v45  ;;  %v803_v34 = vmax.f32 %v777_v27, 0.0  ;;  %v2351_v45 = vld [vmem:[#allocation2 + $0xe8] sm:$0xff]   ;;  %2231 = vmatpush3.bf16.msra.mxu1 %v2359_v53 }
 0x2ec   : > { %v806_v33 = vmax.f32 %v788_v29, 0.0  ;;  %2211 = vmatpush3.bf16.msra.mxu0 %v2351_v45  ;;  %2232 = vmatprep.subr.bf16.mxu1 %v2543_v39 }
 0x2ed   : > { %v804_v35 = vmax.f32 %v780_v31, 0.0  ;;  %2212 = vmatprep.subr.bf16.mxu0 %v2543_v39 }
 0x2ee   : > { %v830_v36 = vpack.c.bf16 %v806_v33, %v805_v32 }
 0x2ef   : > { %v829_v37 = vpack.c.bf16 %v804_v35, %v803_v34  ;;  %2233 = vmatpush3.bf16.msra.mxu1 %v2360_v54 }
 0x2f0   : > { %2213 = vmatpush3.bf16.msra.mxu0 %v2352_v46  ;;  %2234 = vmatprep.subr.bf16.mxu1 %v2543_v39 }
 0x2f1   : > { %2198 = vmatprep.mubr.bf16.mxu1 %v829_v37  ;;  %2214 = vmatprep.subr.bf16.mxu0 %v2543_v39 }
 0x2f2   : > { %2199 = vmatmul.mubr.bf16.gmra.mrb[28].mxu1 %v830_v36 }
 0x2f3   : > { %2238 = vmatprep.mubr.msk.bf16.mxu1 %vm2544_vm1, %v2543_v39  ;;  %2235 = vmatpush3.bf16.msra.mxu1 %v2361_v55 }
 0x2f4   : > { %2215 = vmatpush3.bf16.msra.mxu0 %v2353_v47  ;;  %2236 = vmatprep.subr.bf16.mxu1 %v2543_v39 }
 0x2f5   : > { %2216 = vmatprep.subr.bf16.mxu0 %v2543_v39 }
 0x2f8   : > { %2217 = vmatpush3.bf16.msra.mxu0 %v2354_v48 }
 0x2f9   : > { %2242 = vmatprep.subr.bf16.mxu0 %v2543_v39 }
 0x3ad   : > { %v2188_v58 = vpop.f32.mrb[16].mxu1 }
 0x3ae   : > { %v917_v59 = vpop.f32.mrb[17].mxu1  ;;  %v926_v61 = vadd.f32 %v2188_v58, %v2727_v57 }
 0x3af   : > { %v2189_v60 = vpop.f32.mrb[18].mxu1  ;;  %v918_v0 = vadd.f32 %v917_v59, %v2727_v57 }
 0x3b0   : > { %v929_v62 = vadd.f32 %v2189_v60, %v2727_v57  ;;  %v920_v63 = vpop.f32.mrb[19].mxu1 }
 0x3b1   : > { %v921_v1 = vadd.f32 %v920_v63, %v2727_v57 }
 0x3b2   : > { %v987_v2 = vadd.f32 %v929_v62, %v926_v61 }
 0x3b3   : > { %v980_v3 = vadd.f32 %v921_v1, %v918_v0 }
 0x3b4   : > { %v988_v4 = vrot.slane %v987_v2, 4 }
 0x3b5   : > { %v981_v5 = vrot.slane %v980_v3, 4  ;;  %v2192_v6 = vpop.f32.mrb[20].mxu1 }
 0x3b6   : > { %v989_v7 = vadd.f32 %v988_v4, %v987_v2  ;;  %v933_v8 = vpop.f32.mrb[21].mxu1  ;;  %v942_v12 = vadd.f32 %v2192_v6, %v2727_v57 }
 0x3b7   : > { %v982_v9 = vadd.f32 %v981_v5, %v980_v3  ;;  %v2193_v10 = vpop.f32.mrb[22].mxu1  ;;  %v934_v16 = vadd.f32 %v933_v8, %v2727_v57 }
 0x3b8   : > { %v990_v11 = vrot.slane %v989_v7, 2  ;;  %v945_v13 = vadd.f32 %v2193_v10, %v2727_v57  ;;  %v936_v14 = vpop.f32.mrb[23].mxu1 }
 0x3b9   : > { %v983_v15 = vrot.slane %v982_v9, 2  ;;  %v937_v17 = vadd.f32 %v936_v14, %v2727_v57 }
 0x3ba   : > { %v991_v18 = vadd.f32 %v990_v11, %v989_v7  ;;  %v1001_v19 = vadd.f32 %v945_v13, %v942_v12 }
 0x3bb   : > { %v984_v20 = vadd.f32 %v983_v15, %v982_v9  ;;  %v994_v21 = vadd.f32 %v937_v17, %v934_v16 }
 0x3bc   : > { %v992_v22 = vrot.slane %v991_v18, 1  ;;  %v1002_v23 = vrot.slane %v1001_v19, 4 }
 0x3bd   : > { %v985_v24 = vrot.slane %v984_v20, 1  ;;  %v995_v25 = vrot.slane %v994_v21, 4  ;;  %v2196_v26 = vpop.f32.mrb[24].mxu1 }
 0x3be   : > { %v993_v27 = vadd.f32 %v992_v22, %v991_v18  ;;  %v1003_v28 = vadd.f32 %v1002_v23, %v1001_v19  ;;  %v949_v29 = vpop.f32.mrb[25].mxu1  ;;  %v958_v35 = vadd.f32 %v2196_v26, %v2727_v57 }
 0x3bf   : > { %v986_v30 = vadd.f32 %v985_v24, %v984_v20  ;;  %v996_v31 = vadd.f32 %v995_v25, %v994_v21  ;;  %v2197_v32 = vpop.f32.mrb[26].mxu1  ;;  %v950_v43 = vadd.f32 %v949_v29, %v2727_v57 }
 0x3c0   : > { %v1037_v33 = vmul.f32 0.0625, %v993_v27  ;;  %v1004_v34 = vrot.slane %v1003_v28, 2  ;;  %v961_v36 = vadd.f32 %v2197_v32, %v2727_v57  ;;  %v952_v37 = vpop.f32.mrb[27].mxu1 }
 0x3c1   : > { %v1036_v38 = vmul.f32 0.0625, %v986_v30  ;;  %v997_v41 = vrot.slane %v996_v31, 2  ;;  %v953_v44 = vadd.f32 %v952_v37, %v2727_v57 }
 0x3c2   : > { %v1061_v45 = vpack.c.bf16 %v1037_v33, %v1037_v33  ;;  %v1005_v46 = vadd.f32 %v1004_v34, %v1003_v28  ;;  %v1015_v47 = vadd.f32 %v961_v36, %v958_v35 }
 0x3c3   : > { %v1060_v48 = vpack.c.bf16 %v1036_v38, %v1036_v38  ;;  %v998_v49 = vadd.f32 %v997_v41, %v996_v31  ;;  %v1008_v50 = vadd.f32 %v953_v44, %v950_v43 }
 0x3c4   : > { %v1081_v51 = vunpack.c.l.b16 %v1061_v45  ;;  %v1006_v52 = vrot.slane %v1005_v46, 1  ;;  %v1016_v53 = vrot.slane %v1015_v47, 4 }
 0x3c5   : > { %v1080_v54 = vunpack.c.l.b16 %v1060_v48  ;;  %v999_v55 = vrot.slane %v998_v49, 1  ;;  %v1009_v56 = vrot.slane %v1008_v50, 4  ;;  %v2200_v58 = vpop.f32.mrb[28].mxu1 }
 0x3c6   : > { %v1007_v59 = vadd.f32 %v1006_v52, %v1005_v46  ;;  %v1017_v60 = vadd.f32 %v1016_v53, %v1015_v47  ;;  %v965_v61 = vpop.f32.mrb[29].mxu1  ;;  %v974_v4 = vadd.f32 %v2200_v58, %v2727_v57  ;;  %v2363_v58 = vld [vmem:[#allocation2 + $0x148] sm:$0xff]  }
 0x3c7   : > { %v1089_v62 = vsel %vm1088_vm2, %v1081_v51, %v1080_v54  ;;  %v1000_v63 = vadd.f32 %v999_v55, %v998_v49  ;;  %v1010_v0 = vadd.f32 %v1009_v56, %v1008_v50  ;;  %v2201_v1 = vpop.f32.mrb[30].mxu1  ;;  %v966_v9 = vadd.f32 %v965_v61, %v2727_v57  ;;  %v2362_v56 = vld [vmem:[#allocation2 + $0x140] sm:$0xff]  }
 0x3c8   : > { %v1039_v2 = vmul.f32 0.0625, %v1007_v59  ;;  %v1018_v3 = vrot.slane %v1017_v60, 2  ;;  %v977_v5 = vadd.f32 %v2201_v1, %v2727_v57  ;;  %v968_v6 = vpop.f32.mrb[31].mxu1  ;;  %2237 = vmatpush3.bf16.msra.mxu1 %v2362_v56  ;;  %v2364_v59 = vld [vmem:[#allocation2 + $0x150] sm:$0xff]   ;;  %v2366_v61 = vld [vmem:[#allocation2 + $0x160] sm:$0xff]  }
 0x3c9   : > { %v1038_v7 = vmul.f32 0.0625, %v1000_v63  ;;  %v1011_v8 = vrot.slane %v1010_v0, 2  ;;  %v969_v10 = vadd.f32 %v968_v6, %v2727_v57  ;;  %v2368_v63 = vld [vmem:[#allocation2 + $0x170] sm:$0xff]  }
 0x3ca   : > { %v1063_v11 = vpack.c.bf16 %v1039_v2, %v1039_v2  ;;  %v1019_v12 = vadd.f32 %v1018_v3, %v1017_v60  ;;  %v1029_v13 = vadd.f32 %v977_v5, %v974_v4  ;;  %v2365_v60 = vld [vmem:[#allocation2 + $0x158] sm:$0xff]  }
 0x3cb   : > { %v1062_v14 = vpack.c.bf16 %v1038_v7, %v1038_v7  ;;  %v1012_v15 = vadd.f32 %v1011_v8, %v1010_v0  ;;  %v1022_v16 = vadd.f32 %v969_v10, %v966_v9  ;;  %v1070_v0 = vsub.s32 4, %v2691_v40  ;;  %v2369_v9 = vld [vmem:[#allocation2 + $0x178] sm:$0xff]   ;;  %v2370_v10 = vld [vmem:[#allocation2 + $0x180] sm:$0xff]  }
 0x3cc   : > { %v1020_v17 = vrot.slane %v1019_v12, 1  ;;  %v1030_v18 = vrot.slane %v1029_v13, 4  ;;  %v1083_v22 = vunpack.c.l.b16 %v1063_v11  ;;  %v2371_v11 = vld [vmem:[%s2895_s2] ss:$8 sps:$4 sm:$0xff]  }
 0x3cd   : > { %v1082_v19 = vunpack.c.l.b16 %v1062_v14  ;;  %v1013_v20 = vrot.slane %v1012_v15, 1  ;;  %v1023_v21 = vrot.slane %v1022_v16, 4  ;;  %v1071_v1 = vrot.slane %v2697_v42, %v1070_v0  ;;  %v2379_v14 = vld [vmem:[%s2895_s2 + $0x24] ss:$8 sps:$4 sm:$0xff]  }
 0x3ce   : > { %v1021_v23 = vadd.f32 %v1020_v17, %v1019_v12  ;;  %v1031_v24 = vadd.f32 %v1030_v18, %v1029_v13  ;;  %v2373_v12 = vld [vmem:[%s2895_s2 + $0x4] ss:$8 sps:$4 sm:$0xff]   ;;  %v2376_v13 = vld [vmem:[%s2895_s2 + $0x14] ss:$8 sps:$4 sm:$0xff]   ;;  %v2380_v17 = vld [vmem:[%s2895_s2 + $0x30] ss:$8 sps:$4 sm:$0xff]  }
 0x3cf   : > { %v1091_v25 = vsel %vm1090_vm3, %v1082_v19, %v1089_v62  ;;  %v1014_v26 = vadd.f32 %v1013_v20, %v1012_v15  ;;  %v1024_v27 = vadd.f32 %v1023_v21, %v1022_v16  ;;  %v2367_v62 = vld [vmem:[#allocation2 + $0x168] sm:$0xff]   ;;  %1518 = vmatprep.subr.bf16.mxu1 %v2373_v12  ;;  %v2382_v16 = vld [vmem:[%s2895_s2 + $0x34] ss:$8 sps:$4 sm:$0xff]   ;;  %v2386_v21 = vld [vmem:[%s2895_s2 + $0x50] ss:$8 sps:$4 sm:$0xff]   ;;  %v1432_v0 = vsub.s32 7, %v2691_v40 }
 0x3d0   : > { %v1041_v57 = vmul.f32 0.0625, %v1021_v23  ;;  %v1093_v28 = vsel %vm1092_vm4, %v1083_v22, %v1091_v25  ;;  %v1032_v29 = vrot.slane %v1031_v24, 2  ;;  %v2377_v15 = vld [vmem:[%s2895_s2 + $0x20] ss:$8 sps:$4 sm:$0xff]   ;;  %v2385_v18 = vld [vmem:[%s2895_s2 + $0x44] ss:$8 sps:$4 sm:$0xff]  }
 0x3d1   : > { %v1040_v30 = vmul.f32 0.0625, %v1014_v26  ;;  %v1025_v31 = vrot.slane %v1024_v27, 2  ;;  %v2383_v19 = vld [vmem:[%s2895_s2 + $0x40] ss:$8 sps:$4 sm:$0xff]   ;;  %v2388_v20 = vld [vmem:[%s2895_s2 + $0x54] ss:$8 sps:$4 sm:$0xff]  }
 0x3d2   : > { %v1065_v32 = vpack.c.bf16 %v1041_v57, %v1041_v57  ;;  %v1033_v33 = vadd.f32 %v1032_v29, %v1031_v24  ;;  %v2391_v22 = vld [vmem:[%s2895_s2 + $0x64] ss:$8 sps:$4 sm:$0xff]   ;;  %v2389_v23 = vld [vmem:[%s2895_s2 + $0x60] ss:$8 sps:$4 sm:$0xff]   ;;  %v1212_v24 = vsub.s32 5, %v2691_v40 }
 0x3d3   : > { %v1064_v34 = vpack.c.bf16 %v1040_v30, %v1040_v30  ;;  %v1026_v35 = vadd.f32 %v1025_v31, %v1024_v27 }
 0x3d4   : > { %v1034_v36 = vrot.slane %v1033_v33, 1  ;;  %v1085_v41 = vunpack.c.l.b16 %v1065_v32  ;;  %v1213_v25 = vrot.slane %v2697_v42, %v1212_v24  ;;  %v2394_v32 = vld [vmem:[%s2895_s2 + $0x74] ss:$8 sps:$4 sm:$0xff]   ;;  %v2395_v42 = vld [vmem:[#allocation2 + $0x1c8] sm:$0xff]  }
 0x3d5   : > { %v1084_v37 = vunpack.c.l.b16 %v1064_v34  ;;  %v1027_v38 = vrot.slane %v1026_v35, 1  ;;  %v2545_v34 = vmov 0  }
 0x3d6   : > { %v1035_v43 = vadd.f32 %v1034_v36, %v1033_v33  ;;  %v2392_v33 = vld [vmem:[%s2895_s2 + $0x70] ss:$8 sps:$4 sm:$0xff]  }
 0x3d7   : > { %v1095_v44 = vsel %vm1094_vm5, %v1084_v37, %v1093_v28  ;;  %v1028_v45 = vadd.f32 %v1027_v38, %v1026_v35  ;;  %v2396_v35 = vld [vmem:[#allocation2 + $0x188] sm:$0xff]   ;;  %v2397_v36 = vld [vmem:[#allocation2 + $0x1d0] sm:$0xff]   ;;  %v2399_v38 = vld [vmem:[#allocation2 + $0x1d8] sm:$0xff]  }
 0x3d8   : > { %v1043_v46 = vmul.f32 0.0625, %v1035_v43  ;;  %v1097_v47 = vsel %vm1096_vm6, %v1085_v41, %v1095_v44  ;;  %v2398_v37 = vld [vmem:[#allocation2 + $0x190] sm:$0xff]   ;;  %v2400_v41 = vld [vmem:[#allocation2 + $0x198] sm:$0xff]   ;;  %v2401_v43 = vld [vmem:[#allocation2 + $0x1e0] sm:$0xff]  }
 0x3d9   : > { %v1042_v48 = vmul.f32 0.0625, %v1028_v45  ;;  %v2402_v44 = vld [vmem:[#allocation2 + $0x1a0] sm:$0xff]   ;;  %v2403_v45 = vld [vmem:[#allocation2 + $0x1e8] sm:$0xff]  }
 0x3da   : > { %v1067_v49 = vpack.c.bf16 %v1043_v46, %v1043_v46  ;;  %v2404_v46 = vld [vmem:[#allocation2 + $0x1a8] sm:$0xff]  }
 0x3db   : > { %v1066_v50 = vpack.c.bf16 %v1042_v48, %v1042_v48  ;;  %v2406_v48 = vld [vmem:[#allocation2 + $0x1b0] sm:$0xff]  }
 0x3dc   : > { %v1087_v52 = vunpack.c.l.b16 %v1067_v49  ;;  %v1322_v49 = vsub.s32 6, %v2691_v40 }
 0x3dd   : > { %v1086_v51 = vunpack.c.l.b16 %v1066_v50  ;;  %v2411_v50 = vld [vmem:[%s2896_s3] sm:$0xff] }
 0x3df   : > { %v1099_v53 = vsel %vm1098_vm7, %v1086_v51, %v1097_v47  ;;  %v2405_v47 = vld [vmem:[#allocation2 + $0x1f0] sm:$0xff]   ;;  %v1323_v51 = vrot.slane %v2411_v50, %v1322_v49 }
 0x3e0   : > { %v1101_v54 = vsel %vm1100_vm8, %v1087_v52, %v1099_v53 }
 0x3e1   : > { %v1102_v55 = vpack.c.b16 %v1101_v54, %v1101_v54 }
 0x3e3   : > { %2219 = vmatmul.mubr.bf16.vlgmr.msra.gmra.mrb[32].mxu0 %v1102_v55 }
 0x3e4   : > { %2258 = vmatprep.mubr.msk.bf16.mxu0 %vm2544_vm1, %v2543_v39  ;;  %2243 = vmatpush3.bf16.msra.mxu0 %v2363_v58 }
 0x3e5   : > { %2244 = vmatprep.subr.bf16.mxu0 %v2543_v39 }
 0x3e8   : > { %2245 = vmatpush3.bf16.msra.mxu0 %v2364_v59 }
 0x3e9   : > { %2246 = vmatprep.subr.bf16.mxu0 %v2543_v39 }
 0x3ec   : > { %2247 = vmatpush3.bf16.msra.mxu0 %v2365_v60  ;;  %v2407_v60 = vld [vmem:[#allocation2 + $0x1f8] sm:$0xff]  }
 0x3ed   : > { %2248 = vmatprep.subr.bf16.mxu0 %v2543_v39 }
 0x3f0   : > { %2249 = vmatpush3.bf16.msra.mxu0 %v2366_v61  ;;  %v2408_v61 = vld [vmem:[#allocation2 + $0x1b8] sm:$0xff]  }
 0x3f1   : > { %2250 = vmatprep.subr.bf16.mxu0 %v2543_v39 }
 0x3f4   : > { %2251 = vmatpush3.bf16.msra.mxu0 %v2367_v62  ;;  %v2409_v62 = vld [vmem:[#allocation2 + $0x200] sm:$0xff]  }
 0x3f5   : > { %2252 = vmatprep.subr.bf16.mxu0 %v2543_v39 }
 0x3f8   : > { %2253 = vmatpush3.bf16.msra.mxu0 %v2368_v63  ;;  %v2410_v63 = vld [vmem:[#allocation2 + $0x1c0] sm:$0xff]  }
 0x3f9   : > { %2254 = vmatprep.subr.bf16.mxu0 %v2543_v39 }
 0x3fc   : > { %2255 = vmatpush3.bf16.msra.mxu0 %v2369_v9 }
 0x3fd   : > { %2256 = vmatprep.subr.bf16.mxu0 %v2543_v39  ;;  %v2374_v39 = vld [vmem:[%s2895_s2 + $0x10] ss:$8 sps:$4 sm:$0xff]  }
 0x400   : > { %2257 = vmatpush3.bf16.msra.mxu0 %v2370_v10 }
 0x401   : > { %2066 = vmatprep.subr.bf16.mxu0 %v2395_v42 }
 0x4b6   : > { %v1186_v2 = vpop.f32.mrb[32].mxu0 }
 0x4b7   : > { %v1187_v3 = vadd.f32 %v1186_v2, %v1071_v1  ;;  %v2220_v4 = vpop.f32.mrb[33].mxu0  ;;  %v253_v1 = vld [vmem:[%s2896_s3 + $0x8] sm:$0xff]  ;;  %v1433_v2 = vrot.slane %v2411_v50, %v1432_v0 }
 0x4b8   : > { %v1189_v5 = vpop.f32.mrb[34].mxu0 }
 0x4b9   : > { %v1192_v6 = vmax.f32 %v1187_v3, 0.0  ;;  %v2221_v7 = vpop.f32.mrb[35].mxu0  ;;  %v1437_v3 = vrot.slane %v253_v1, %v1432_v0 }
 0x4bb   : > { %v1209_v8 = vpack.c.bf16 %v1192_v6, %v1192_v6 }
 0x4bd   : > { %2239 = vmatmul.mubr.bf16.vlgmr.msra.gmra.mrb[32].mxu1 %v1209_v8 }
 0x4be   : > { %1519 = vmatpush1.bf16.msra.mxu1 %v2371_v11  ;;  %1550 = vmatprep.mubr.bf16.mxu1 %v2545_v34 }
 0x4bf   : > { %1520 = vmatprep.subr.bf16.mxu1 %v2376_v13 }
 0x4c2   : > { %1521 = vmatpush1.bf16.msra.mxu1 %v2374_v39 }
 0x4c3   : > { %1522 = vmatprep.subr.bf16.mxu1 %v2379_v14 }
 0x4c6   : > { %1523 = vmatpush1.bf16.msra.mxu1 %v2377_v15 }
 0x4c7   : > { %1524 = vmatprep.subr.bf16.mxu1 %v2382_v16 }
 0x4ca   : > { %1525 = vmatpush1.bf16.msra.mxu1 %v2380_v17 }
 0x4cb   : > { %1526 = vmatprep.subr.bf16.mxu1 %v2385_v18 }
 0x4ce   : > { %1527 = vmatpush1.bf16.msra.mxu1 %v2383_v19 }
 0x4cf   : > { %1528 = vmatprep.subr.bf16.mxu1 %v2388_v20 }
 0x4d2   : > { %1529 = vmatpush1.bf16.msra.mxu1 %v2386_v21 }
 0x4d3   : > { %1530 = vmatprep.subr.bf16.mxu1 %v2391_v22 }
 0x4d6   : > { %1531 = vmatpush1.bf16.msra.mxu1 %v2389_v23 }
 0x4d7   : > { %1532 = vmatprep.subr.bf16.mxu1 %v2394_v32 }
 0x4da   : > { %1533 = vmatpush1.bf16.msra.mxu1 %v2392_v33 }
 0x590   : > { %v1296_v26 = vpop.f32.mrb[32].mxu1 }
 0x591   : > { %v1297_v27 = vadd.f32 %v1296_v26, %v1213_v25  ;;  %v2240_v57 = vpop.f32.mrb[33].mxu1 }
 0x592   : > { %v1299_v28 = vpop.f32.mrb[34].mxu1 }
 0x593   : > { %v1302_v29 = vmax.f32 %v1297_v27, 0.0  ;;  %v2241_v30 = vpop.f32.mrb[35].mxu1 }
 0x595   : > { %v1319_v31 = vpack.c.bf16 %v1302_v29, %v1302_v29 }
 0x597   : > { %2259 = vmatmul.mubr.bf16.vlgmr.msra.gmra.mrb[36].mxu0 %v1319_v31 }
 0x598   : > { %2067 = vmatpush3.bf16.msra.mxu0 %v2396_v35 }
 0x599   : > { %2068 = vmatprep.subr.bf16.mxu0 %v2397_v36 }
 0x59c   : > { %2069 = vmatpush3.bf16.msra.mxu0 %v2398_v37 }
 0x59d   : > { %2070 = vmatprep.subr.bf16.mxu0 %v2399_v38 }
 0x5a0   : > { %2071 = vmatpush3.bf16.msra.mxu0 %v2400_v41 }
 0x5a1   : > { %2072 = vmatprep.subr.bf16.mxu0 %v2401_v43 }
 0x5a4   : > { %2073 = vmatpush3.bf16.msra.mxu0 %v2402_v44 }
 0x5a5   : > { %2074 = vmatprep.subr.bf16.mxu0 %v2403_v45 }
 0x5a8   : > { %2075 = vmatpush3.bf16.msra.mxu0 %v2404_v46 }
 0x5a9   : > { %2076 = vmatprep.subr.bf16.mxu0 %v2405_v47 }
 0x5ac   : > { %2077 = vmatpush3.bf16.msra.mxu0 %v2406_v48 }
 0x5ad   : > { %2078 = vmatprep.subr.bf16.mxu0 %v2407_v60 }
 0x5b0   : > { %2079 = vmatpush3.bf16.msra.mxu0 %v2408_v61 }
 0x5b1   : > { %2080 = vmatprep.subr.bf16.mxu0 %v2409_v62 }
 0x5b4   : > { %2081 = vmatpush3.bf16.msra.mxu0 %v2410_v63 }
 0x66a   : > { %v1406_v52 = vpop.f32.mrb[36].mxu0 }
 0x66b   : > { %v1407_v53 = vadd.f32 %v1406_v52, %v1323_v51  ;;  %v2260_v54 = vpop.f32.mrb[37].mxu0 }
 0x66c   : > { %v1409_v55 = vpop.f32.mrb[38].mxu0 }
 0x66d   : > { %v1412_v56 = vmax.f32 %v1407_v53, 0.0  ;;  %v2261_v58 = vpop.f32.mrb[39].mxu0 }
 0x66f   : > { %v1413_v59 = vpack.c.bf16 %v1412_v56, %v1412_v56 }
 0x671   : > { %1551 = vmatmul.mubr.bf16.vlgmr.msra.gmra.mrb[36].mxu1 %v1413_v59 }
 0x744   : > { %v1552_v4 = vpop.f32.mrb[36].mxu1 }
 0x745   : > { %v1553_v5 = vadd.f32 %v1552_v4, %v1433_v2  ;;  %v1554_v6 = vpop.f32.mrb[37].mxu1 }
 0x746   : > { %v1555_v7 = vadd.f32 %v1554_v6, %v1437_v3  ;;  %v1556_v8 = vpop.f32.mrb[38].mxu1 }
 0x747   : > { %1559 = vst [vmem:[%s237_s23] sm:$0xff] %v1553_v5  ;;  %v1561_v40 = vmax.f32 %v1553_v5, 0.0  ;;  %v1557_v9 = vpop.f32.mrb[39].mxu1 }
 0x748   : > { %1560 = vst [vmem:[%s237_s23 + $0x8] sm:$0xff] %v1555_v7  ;;  %v1562_v10 = vmax.f32 %v1555_v7, 0.0 }
 0x749   : > { %v1595_v12 = vpack.c.bf16 %v1561_v40, %v1561_v40 }
 0x74a   : > { %v1596_v11 = vpack.c.bf16 %v1562_v10, %v1562_v10 }
 0x74c   : > { %1729 = vmatprep.mubr.bf16.mxu0 %v1596_v11 }
 0x74d   : > { %1730 = vmatmul.mubr.bf16.vlgmr.msra.gmra.mrb[40].mxu0 %v1595_v12 }
 0x74e   : > { %2453 = shalt.err (!%p2450_p7)
}
 0x74f   : > { %s2454_s13 = scalar_lea.hbm %s2822_s9, 256  ;;  %s2458_s17 = scalar_lea.hbm %s2897_s4, 512 }
 0x750   : > { %p2455_p8 = scmp.ne.s32.totalorder %s2822_s9, %s2454_s13  ;;  %p2459_p1 = scmp.lt.u32.totalorder %s2822_s9, %s2897_s4 }
 0x751   : > { %p2460_p0 = scmp.lt.u32.totalorder %s2458_s17, %s2454_s13  ;;  %p2462_p6 = scmp.lt.u32.totalorder %s2454_s13, %s2822_s9 }
 0x752   : > { %p2456_p11 = pnand %p2455_p8, %p2909_p9 }
 0x753   : > { %p2461_p5 = por %p2460_p0, %p2459_p1 }
 0x754   : > { %p2457_p13 = pneg %p2456_p11 }
 0x755   : > { %p2463_p10 = por %p2462_p6, %p2461_p5 }
 0x757   : > { %p2464_p12 = pnand %p2463_p10, %p2457_p13 }
 0x759   : > { %2467 = shalt.err (!%p2464_p12)
}
 0x75a   : > { %2266 = dma.vmem_to_hbm [thread:$0]  (%p2909_p9), %s1759_s10, 256, %s2822_s9, %s1739_s8   ;;  %v1957_v39 = vld [vmem:[%s2896_s3 + $0x10] ss:$0 sm:$0xff] }
 0x75b   : > { %s1881_s26 = sshll.u32 %s2812_s14, 3  ;;  %s1978_s30 = sshll.u32 %s2599_s22, 7 }
 0x75c   : > { %s244_s7 = scalar_lea.vmem [#allocation6], %s1881_s26  ;;  %s2850_s16 = scalar_lea.hbm %s2898_s5, %s1978_s30 }
 0x75d   : > { %s1771_s12 = sshll.u32 %s244_s7, 4  ;;  %s1744_s9 = scalar_lea.sflag [#allocation7], %s2812_s14  ;;  %s2852_s12 = int_to_ptr.vmem [resolvable:$true] %s1771_s12 }
 0x75e   : > { %s2468_s10 = scalar_lea.vmem %s2852_s12, 128  ;;  %s2547_s22 = smov [#allocation6]  }
 0x75f   : > { %p2469_p2 = scmp.ne.s32.totalorder %s2852_s12, %s2468_s10  ;;  %s2472_s8 = sshll.u32 %s2547_s22, 4  ;;  %s2473_s8 = int_to_ptr.vmem [resolvable:$false] %s2472_s8 }
 0x760   : > { %s2474_s17 = scalar_lea.vmem %s2473_s8, 256  ;;  %p2475_p7 = scmp.lt.s32.totalorder %s2852_s12, %s2473_s8 }
 0x761   : > { %p2470_p3 = pnand %p2469_p2, %p2909_p9  ;;  %p2476_p8 = scmp.lt.s32.totalorder %s2474_s17, %s2468_s10 }
 0x763   : > { %p2471_p4 = pneg %p2470_p3  ;;  %p2477_p11 = por %p2476_p8, %p2475_p7 }
 0x765   : > { %p2478_p13 = pnand %p2477_p11, %p2471_p4 }
 0x820   : > { %v2082_v13 = vpop.f32.mrb[40].mxu0 }
 0x821   : > { %v2083_v14 = vpop.f32.mrb[41].mxu0 }
 0x822   : > { %v2084_v15 = vadd.f32 %v2083_v14, %v2082_v13  ;;  %v2085_v16 = vpop.f32.mrb[42].mxu0 }
 0x823   : > { %v2086_v17 = vpop.f32.mrb[43].mxu0 }
 0x824   : > { %v1732_v18 = vadd.f32 %v2084_v15, %v1957_v39 }
 0x826   : > { %1737 = vst [vmem:[%s244_s7] sm:$0xff] %v1732_v18 }
 0x827   : > { %2481 = shalt.err (!%p2478_p13)
}
 0x828   : > { %s2482_s14 = scalar_lea.hbm %s2850_s16, 128  ;;  %s2486_s26 = scalar_lea.hbm %s2898_s5, 256 }
 0x829   : > { %p2483_p1 = scmp.ne.s32.totalorder %s2850_s16, %s2482_s14  ;;  %p2487_p6 = scmp.lt.u32.totalorder %s2850_s16, %s2898_s5 }
 0x82a   : > { %p2488_p10 = scmp.lt.u32.totalorder %s2486_s26, %s2482_s14  ;;  %p2490_p2 = scmp.lt.u32.totalorder %s2482_s14, %s2850_s16 }
 0x82b   : > { %p2484_p0 = pnand %p2483_p1, %p2909_p9 }
 0x82c   : > { %p2489_p12 = por %p2488_p10, %p2487_p6 }
 0x82d   : > { %p2485_p5 = pneg %p2484_p0 }
 0x82e   : > { %p2491_p3 = por %p2490_p2, %p2489_p12 }
 0x830   : > { %p2492_p4 = pnand %p2491_p3, %p2485_p5 }
 0x832   : > { %2495 = shalt.err (!%p2492_p4)
}
 0x833   : > { %2267 = dma.vmem_to_hbm [thread:$0]  (%p2909_p9), %s2852_s12, 128, %s2850_s16, %s1744_s9  }
 0x834 PF: > { %p2283_p7 = scmp.ge.s32.totalorder %s2538_s21, 2  ;;  %s1783_s30 = sand.u32 1, %s2526_s18  }
 0x835   : > { %p2910_p8 = scmp.ne.s32.totalorder %s2903_s29, 0  ;;  %s1784_s7 = scalar_lea.sflag [#allocation4], %s1783_s30 }
 0x837   : > { %p2275_p11 = pnand %p2283_p7, %p2910_p8 }
 0x839   : > { %2517 = dma.done.wait (!%p2275_p11), %s1784_s7, 256  }
 0x83a   : > { %2519 = vsyncadd (!%p2275_p11), %s1784_s7, 4294967040  ;;  %s1793_s13 = scalar_lea.sflag [#allocation7], %s1783_s30 }
 0x83b   : > { %2521 = dma.done.wait (!%p2275_p11), %s1793_s13, 128  }
 0x83c   : > { %2523 = vsyncadd (!%p2275_p11), %s1793_s13, 4294967168  ;;  %p20_p9 = scmp.ge.s32.totalorder %s2603_s24, 4   ;;  %s2911_s18 = smov %s2530_s19 }
 0x83d   : > { %s2912_s19 = smov %s2534_s20  ;;  %s2913_s20 = smov %s2614_s27 }
 0x83e   : > { %s2914_s21 = smov %s2603_s24  ;;  %22 = sbr.rel (!%p20_p9) target bundleno = 6 (0x6), region = 93 }
 0x845   :  { %1798 = vsyncpa [#allocation3], 1 }
 0x846   :  { %1800 = vsyncpa [#allocation3 + $0x1], 1 }
 0x847   :  { %1801 = vsyncpa [#allocation4], 1 }
 0x848   :  { %1803 = vsyncpa [#allocation4 + $0x1], 1 }
 0x849   :  { %1804 = vsyncpa [#allocation7], 1 }
 0x84a   :  { %1806 = vsyncpa [#allocation7 + $0x1], 1 }

</bundles_post_ra>
